<compile_context>
chip_gen: v5e
topology: v5e:2x2
jax: 0.10.0
libtpu: 0.0.40
codegen_flags: <defaults>
</compile_context>

<pallas_src>
import jax
import jax.numpy as jnp
from jax.experimental import pallas as pl
from jax.experimental.pallas import tpu as pltpu

B, IN, HID, OUT = 2, 20, 256, 10
LANE = 128                      # lane-dense padding for the tiny output dim
OUT_PAD = LANE                  # 10 -> 128


def mlp_kernel(x_ref, w1t_ref, b1_ref, w2t_ref, b2_ref, o_ref):
    x = x_ref[...]              # (B, 20)        f32, whole-ref read
    w1t = w1t_ref[...]          # (20, 256)      W1.T
    b1 = b1_ref[...]            # (1, 256)
    w2t = w2t_ref[...]          # (256, 128)     W2.T zero-padded on lanes 10..127
    b2 = b2_ref[...]            # (1, 128)       b2  zero-padded on lanes 10..127

    # h = relu(X @ W1.T + b1)
    h = jnp.dot(x, w1t, preferred_element_type=jnp.float32) + b1
    h = jnp.maximum(h, 0.0)

    # y_pad = h @ W2.T_pad + b2_pad   -> (B, 128), cols 10..127 are exact zeros
    o = jnp.dot(h, w2t, preferred_element_type=jnp.float32) + b2
    o_ref[...] = o.astype(o_ref.dtype)          # unmasked, full-lane store


def prepare_params(w1, b1, w2, b2):
    """One-time, off-hot-path layout prep: transpose weights and lane-pad layer 2."""
    w1t = jnp.asarray(w1.T, dtype=jnp.float32)                      # (20, 256)
    b1r = jnp.asarray(b1, dtype=jnp.float32).reshape(1, HID)        # (1, 256)
    w2t_pad = jnp.zeros((HID, OUT_PAD), dtype=jnp.float32)
    w2t_pad = w2t_pad.at[:, :OUT].set(jnp.asarray(w2.T, jnp.float32))  # (256, 128)
    b2_pad = jnp.zeros((1, OUT_PAD), dtype=jnp.float32)
    b2_pad = b2_pad.at[0, :OUT].set(jnp.asarray(b2, jnp.float32))      # (1, 128)
    return w1t, b1r, w2t_pad, b2_pad


def my_module_forward(x, w1t, b1r, w2t_pad, b2_pad):
    """x: (B, 20). Returns (B, 10)."""
    vmem = pl.BlockSpec(memory_space=pltpu.MemorySpace.VMEM)
    y_pad = pl.pallas_call(
        mlp_kernel,
        out_shape=jax.ShapeDtypeStruct((x.shape[0], OUT_PAD), jnp.float32),
        # Single program, full arrays resident in VMEM (no grid / no tiling).
        in_specs=[vmem, vmem, vmem, vmem, vmem],
        out_specs=vmem,
    )(x, w1t, b1r, w2t_pad, b2_pad)
    return y_pad[:, :OUT]       # drop zero lane-padding


def reference(x, w1, b1, w2, b2):
    h = jnp.maximum(x @ w1.T + b1, 0.0)
    return h @ w2.T + b2


if __name__ == "__main__":
    key = jax.random.PRNGKey(0)
    kx, kw1, kb1, kw2, kb2 = jax.random.split(key, 5)

    # X = torch.rand(2, 20)
    x = jax.random.uniform(kx, (B, IN), dtype=jnp.float32)

    # nn.Linear default init: U(-1/sqrt(fan_in), 1/sqrt(fan_in))
    bound1 = 1.0 / float(IN) ** 0.5
    w1 = jax.random.uniform(kw1, (HID, IN), dtype=jnp.float32,
                            minval=-bound1, maxval=bound1)
    b1 = jax.random.uniform(kb1, (HID,), dtype=jnp.float32,
                            minval=-bound1, maxval=bound1)
    bound2 = 1.0 / float(HID) ** 0.5
    w2 = jax.random.uniform(kw2, (OUT, HID), dtype=jnp.float32,
                            minval=-bound2, maxval=bound2)
    b2 = jax.random.uniform(kb2, (OUT,), dtype=jnp.float32,
                            minval=-bound2, maxval=bound2)

    # Layout prep done once, outside the kernel call path.
    w1t, b1r, w2t_pad, b2_pad = prepare_params(w1, b1, w2, b2)

    y = my_module_forward(x, w1t, b1r, w2t_pad, b2_pad)
    y = jax.block_until_ready(y)

    y_ref = reference(x, w1, b1, w2, b2)
    assert y.shape == (B, OUT), y.shape
    assert jnp.allclose(y, y_ref, rtol=1e-5, atol=1e-5), (y, y_ref)

    print("KERNEL_OK")
</pallas_src>

<mosaic_0001>
module attributes {stable_mosaic.version = 11 : i64} {
  func.func @mlp_kernel(%arg0: memref<2x20xf32, #tpu.memory_space<vmem>>, %arg1: memref<20x256xf32, #tpu.memory_space<vmem>>, %arg2: memref<1x256xf32, #tpu.memory_space<vmem>>, %arg3: memref<256x128xf32, #tpu.memory_space<vmem>>, %arg4: memref<1x128xf32, #tpu.memory_space<vmem>>, %arg5: memref<2x128xf32, #tpu.memory_space<vmem>>) attributes {dimension_semantics = [], scalar_prefetch = 0 : i64, scratch_operands = 0 : i64, tpu.core_type = #tpu.core_type<tc>} {
    %c0 = arith.constant 0 : index
    %c0_0 = arith.constant 0 : index
    %0 = vector.load %arg0[%c0, %c0_0] : memref<2x20xf32, #tpu.memory_space<vmem>>, vector<2x20xf32>
    %c0_1 = arith.constant 0 : index
    %c0_2 = arith.constant 0 : index
    %1 = vector.load %arg1[%c0_1, %c0_2] : memref<20x256xf32, #tpu.memory_space<vmem>>, vector<20x256xf32>
    %c0_3 = arith.constant 0 : index
    %c0_4 = arith.constant 0 : index
    %2 = vector.load %arg2[%c0_3, %c0_4] : memref<1x256xf32, #tpu.memory_space<vmem>>, vector<1x256xf32>
    %c0_5 = arith.constant 0 : index
    %c0_6 = arith.constant 0 : index
    %3 = vector.load %arg3[%c0_5, %c0_6] : memref<256x128xf32, #tpu.memory_space<vmem>>, vector<256x128xf32>
    %c0_7 = arith.constant 0 : index
    %c0_8 = arith.constant 0 : index
    %4 = vector.load %arg4[%c0_7, %c0_8] : memref<1x128xf32, #tpu.memory_space<vmem>>, vector<1x128xf32>
    %cst = arith.constant dense<0.000000e+00> : vector<2x256xf32>
    %5 = tpu.matmul %0, %1, %cst {dimension_numbers = #tpu.dot_dimension_numbers<[1], [0], [0], [1], [0, 0, 1, 1], [], []>} : vector<2x20xf32>, vector<20x256xf32>, vector<2x256xf32> -> vector<2x256xf32>
    %6 = vector.broadcast %2 : vector<1x256xf32> to vector<2x256xf32>
    %7 = arith.addf %5, %6 : vector<2x256xf32>
    %cst_9 = arith.constant 0.000000e+00 : f32
    %8 = vector.broadcast %cst_9 : f32 to vector<2x256xf32>
    %9 = arith.maximumf %7, %8 : vector<2x256xf32>
    %cst_10 = arith.constant dense<0.000000e+00> : vector<2x128xf32>
    %10 = tpu.matmul %9, %3, %cst_10 {dimension_numbers = #tpu.dot_dimension_numbers<[1], [0], [0], [1], [0, 0, 1, 1], [], []>} : vector<2x256xf32>, vector<256x128xf32>, vector<2x128xf32> -> vector<2x128xf32>
    %11 = vector.broadcast %4 : vector<1x128xf32> to vector<2x128xf32>
    %12 = arith.addf %10, %11 : vector<2x128xf32>
    %c0_11 = arith.constant 0 : index
    %c0_12 = arith.constant 0 : index
    %13 = vector.load %arg5[%c0_11, %c0_12] : memref<2x128xf32, #tpu.memory_space<vmem>>, vector<2x128xf32>
    tpu.vector_store %arg5[%c0_11, %c0_12], %12 {strides = array<i32>} : memref<2x128xf32, #tpu.memory_space<vmem>>, vector<2x128xf32>,
    return
  }
}

</mosaic_0001>

<bundles_post_ra>
// kernel: tpu_custom_call.1
= control target key start
LH: loop header
LB: loop body
LE: loop exit
PB: predicated region body
PF: predicated region fallthrough
CT: control target
= control target key end

     0   :  { %10 = vsyncpa [#allocation3], 0  ;;  %s441_s0 = inlined_call_operand.hbm [shape: f32[2,20], index: 0, kind: input, shape index: {}]   ;;  %s442_s1 = inlined_call_operand.hbm [shape: f32[20,256], index: 1, kind: input, shape index: {}]   ;;  %s443_s2 = inlined_call_operand.hbm [shape: f32[1,256], index: 2, kind: input, shape index: {}]   ;;  %s444_s3 = inlined_call_operand.hbm [shape: f32[256,128], index: 3, kind: input, shape index: {}]   ;;  %s445_s4 = inlined_call_operand.vmem [shape: f32[1,128], index: 4, kind: input, shape index: {}]   ;;  %s446_s5 = inlined_call_operand.hbm [shape: f32[2,128], index: 5, kind: output, shape index: {}]  }
   0x1   :  { %11 = vsyncpa [#allocation6], 0 }
   0x2   :  { %12 = vsyncpa [#allocation9], 0  ;;  %s29_s20 = sshll.u32 %s442_s1, 4  ;;  %s30_s20 = int_to_ptr.hbm [resolvable:$true] %s29_s20 }
   0x3   :  { %13 = vsyncpa [#allocation4], 0  ;;  %s384_s21 = smov [#allocation5]   ;;  %s19_s25 = sshll.u32 %s441_s0, 4  ;;  %s20_s25 = int_to_ptr.hbm [resolvable:$true] %s19_s25 }
   0x4   :  { %s31_s22 = sshll.u32 %s384_s21, 4  ;;  %s385_s26 = smov 256   ;;  %s32_s22 = int_to_ptr.vmem [resolvable:$true] %s31_s22 }
   0x5   :  { %s386_s27 = smov 16   ;;  %s387_s28 = smov [#allocation2]  }
   0x6   :  { %37 = dma.hbm_to_vmem [thread:$0]  %s30_s20, 768, %s32_s22, [#allocation6], %s385_s26, %s385_s26, %s386_s27  }
   0x7   :  { %s21_s29 = sshll.u32 %s387_s28, 4  ;;  %s43_s7 = sshll.u32 %s443_s2, 4  ;;  %s22_s29 = int_to_ptr.vmem [resolvable:$true] %s21_s29  ;;  %s44_s7 = int_to_ptr.hbm [resolvable:$true] %s43_s7 }
   0x8   :  { %24 = dma.hbm_to_vmem [thread:$0]  %s20_s25, 32, %s22_s29, [#allocation3]  }
   0x9   :  { %s53_s9 = sshll.u32 %s444_s3, 4  ;;  %s388_s10 = smov [#allocation7]   ;;  %s54_s9 = int_to_ptr.hbm [resolvable:$true] %s53_s9 }
   0xa   :  { %s45_s11 = sshll.u32 %s388_s10, 4  ;;  %s389_s0 = smov [#allocation8]   ;;  %s46_s11 = int_to_ptr.vmem [resolvable:$true] %s45_s11 }
   0xb   :  { %48 = dma.hbm_to_vmem [thread:$0]  %s44_s7, 32, %s46_s11, [#allocation6]  }
   0xc   :  { %s55_s12 = sshll.u32 %s389_s0, 4  ;;  %s390_s13 = smov 128   ;;  %s56_s12 = int_to_ptr.vmem [resolvable:$true] %s55_s12 }
   0xd   :  { %s391_s14 = smov 8  }
   0xe   :  { %61 = dma.hbm_to_vmem [thread:$0]  %s54_s9, 4096, %s56_s12, [#allocation9], %s390_s13, %s390_s13, %s391_s14  }
   0xf   :  { %376 = dma.done.wait [#allocation3], 32  }
  0x10   :  { %377 = vsyncadd [#allocation3], 4294967264 }
  0x11   :  { %378 = dma.done.wait [#allocation6], 800  }
  0x12   :  { %379 = vsyncadd [#allocation6], 4294966496 }
  0x13   :  { %380 = dma.done.wait [#allocation9], 4096  }
  0x14   :  { %381 = vsyncadd [#allocation9], 4294963200  ;;  %vm130_vm0 = vcmask 1043456   ;;  %v85_v0 = vld [vmem:[#allocation5 + $0x20] sm:$0xf]  ;;  %v83_v1 = vld [vmem:[#allocation5 + $0x10] sm:$0xff] }
  0x15   :  { %v86_v2 = vld [vmem:[#allocation5 + $0x28] sm:$0xf]  ;;  %242 = vmatpush.msk.msra.mxu0 %vm130_vm0, %v85_v0  ;;  %v84_v3 = vld [vmem:[#allocation5 + $0x18] sm:$0xff]  ;;  %v81_v4 = vld [vmem:[#allocation5] sm:$0xff]  ;;  %vm126_vm1 = vcmask 162816   ;;  %s392_s15 = smov [#allocation10]  }
  0x16   :  { %244 = vmatpush.msk.msra.mxu1 %vm130_vm0, %v86_v2  ;;  %v82_v5 = vld [vmem:[#allocation5 + $0x8] sm:$0xff]  ;;  %v80_v7 = vld [vmem:[#allocation2] sm:$0x3]  ;;  %v100_v13 = vld [vmem:[#allocation8 + $0x60] sm:$0xff]  ;;  %s228_s16 = sshll.u32 %s392_s15, 4  ;;  %s230_s19 = sshll.u32 %s446_s5, 4  ;;  %s229_s16 = int_to_ptr.vmem [resolvable:$true] %s228_s16  ;;  %s231_s19 = int_to_ptr.hbm [resolvable:$true] %s230_s19 }
  0x17   :  { %v103_v6 = vld [vmem:[#allocation8 + $0x78] sm:$0xff]  ;;  %151 = vmatpush.msra.mxu0 %v83_v1  ;;  %v102_v9 = vld [vmem:[#allocation8 + $0x70] sm:$0xff]  ;;  %v101_v11 = vld [vmem:[#allocation8 + $0x68] sm:$0xff] }
  0x18   :  { %171 = vmatpush.msra.mxu1 %v84_v3  ;;  %v119_v8 = vld [vmem:[#allocation8 + $0xf8] sm:$0xff]  ;;  %182 = vmatpush.msra.mxu2 %v103_v6  ;;  %v118_v10 = vld [vmem:[#allocation8 + $0xf0] sm:$0xff]  ;;  %v117_v12 = vld [vmem:[#allocation8 + $0xe8] sm:$0xff] }
  0x19   :  { %202 = vmatpush.msra.mxu3 %v119_v8  ;;  %152 = vmatpush.msra.mxu0 %v81_v4  ;;  %v116_v14 = vld [vmem:[#allocation8 + $0xe0] sm:$0xff]  ;;  %v99_v15 = vld [vmem:[#allocation8 + $0x58] sm:$0xff]  ;;  %v98_v17 = vld [vmem:[#allocation8 + $0x50] sm:$0xff] }
  0x1a   :  { %172 = vmatpush.msra.mxu1 %v82_v5  ;;  %243 = vmatmul.msk.f32.vlgmr.msra.gmra.mxu0 %vm126_vm1, %v80_v7  ;;  %v115_v16 = vld [vmem:[#allocation8 + $0xd8] sm:$0xff]  ;;  %v114_v18 = vld [vmem:[#allocation8 + $0xd0] sm:$0xff]  ;;  %v97_v19 = vld [vmem:[#allocation8 + $0x48] sm:$0xff] }
  0x1b   :  { %245 = vmatmul.msk.f32.vlgmr.msra.gmra.mxu1 %vm126_vm1, %v80_v7  ;;  %183 = vmatpush.msra.mxu2 %v102_v9  ;;  %v113_v20 = vld [vmem:[#allocation8 + $0xc8] sm:$0xff]  ;;  %v96_v21 = vld [vmem:[#allocation8 + $0x40] sm:$0xff]  ;;  %v95_v23 = vld [vmem:[#allocation8 + $0x38] sm:$0xff] }
  0x1c   :  { %203 = vmatpush.msra.mxu3 %v118_v10  ;;  %v112_v22 = vld [vmem:[#allocation8 + $0xc0] sm:$0xff]  ;;  %v111_v24 = vld [vmem:[#allocation8 + $0xb8] sm:$0xff]  ;;  %v94_v25 = vld [vmem:[#allocation8 + $0x30] sm:$0xff] }
  0x1d   :  { %184 = vmatpush.msra.mxu2 %v101_v11  ;;  %v110_v26 = vld [vmem:[#allocation8 + $0xb0] sm:$0xff]  ;;  %v93_v27 = vld [vmem:[#allocation8 + $0x28] sm:$0xff]  ;;  %v92_v29 = vld [vmem:[#allocation8 + $0x20] sm:$0xff] }
  0x1e   :  { %204 = vmatpush.msra.mxu3 %v117_v12  ;;  %v109_v28 = vld [vmem:[#allocation8 + $0xa8] sm:$0xff]  ;;  %v108_v30 = vld [vmem:[#allocation8 + $0xa0] sm:$0xff]  ;;  %v91_v31 = vld [vmem:[#allocation8 + $0x18] sm:$0xff] }
  0x1f   :  { %185 = vmatpush.msra.mxu2 %v100_v13  ;;  %v90_v32 = vld [vmem:[#allocation8 + $0x10] sm:$0xff]  ;;  %v107_v33 = vld [vmem:[#allocation8 + $0x98] sm:$0xff]  ;;  %v89_v34 = vld [vmem:[#allocation8 + $0x8] sm:$0xff] }
  0x20   :  { %205 = vmatpush.msra.mxu3 %v116_v14  ;;  %v106_v35 = vld [vmem:[#allocation8 + $0x90] sm:$0xff]  ;;  %v88_v36 = vld [vmem:[#allocation8] sm:$0xff]  ;;  %v105_v37 = vld [vmem:[#allocation8 + $0x88] sm:$0xff] }
  0x21   :  { %186 = vmatpush.msra.mxu2 %v99_v15  ;;  %v104_v38 = vld [vmem:[#allocation8 + $0x80] sm:$0xff]  ;;  %v87_v39 = vld [vmem:[#allocation7] sm:$0x3]  ;;  %v255_v48 = vld [vmem:[%s445_s4] ss:$0 sm:$0xff] }
  0x22   :  { %206 = vmatpush.msra.mxu3 %v115_v16  ;;  %v122_v40 = vperm.slane %v87_v39, 0  ;;  %v123_v41 = vperm.slane %v87_v39, 1 }
  0x23   :  { %187 = vmatpush.msra.mxu2 %v98_v17 }
  0x24   :  { %207 = vmatpush.msra.mxu3 %v114_v18 }
  0x25   :  { %188 = vmatpush.msra.mxu2 %v97_v19 }
  0x26   :  { %208 = vmatpush.msra.mxu3 %v113_v20 }
  0x27   :  { %189 = vmatpush.msra.mxu2 %v96_v21 }
  0x28   :  { %209 = vmatpush.msra.mxu3 %v112_v22 }
  0x29   :  { %190 = vmatpush.msra.mxu2 %v95_v23 }
  0x2a   :  { %210 = vmatpush.msra.mxu3 %v111_v24 }
  0x2b   :  { %191 = vmatpush.msra.mxu2 %v94_v25 }
  0x2c   :  { %211 = vmatpush.msra.mxu3 %v110_v26 }
  0x2d   :  { %192 = vmatpush.msra.mxu2 %v93_v27 }
  0x2e   :  { %212 = vmatpush.msra.mxu3 %v109_v28 }
  0x2f   :  { %193 = vmatpush.msra.mxu2 %v92_v29 }
  0x30   :  { %213 = vmatpush.msra.mxu3 %v108_v30 }
  0x31   :  { %194 = vmatpush.msra.mxu2 %v91_v31 }
  0x32   :  { %214 = vmatpush.msra.mxu3 %v107_v33 }
  0x33   :  { %195 = vmatpush.msra.mxu2 %v90_v32 }
  0x34   :  { %215 = vmatpush.msra.mxu3 %v106_v35 }
  0x35   :  { %196 = vmatpush.msra.mxu2 %v89_v34 }
  0x36   :  { %216 = vmatpush.msra.mxu3 %v105_v37 }
  0x37   :  { %197 = vmatpush.msra.mxu2 %v88_v36 }
  0x38   :  { %217 = vmatpush.msra.mxu3 %v104_v38 }
  0x97   :  { %v154_v42 = vpop.f32.mrf.mxu0 }
  0x98   :  { %v174_v43 = vpop.f32.mrf.mxu1  ;;  %v155_v44 = vadd.f32 %v154_v42, %v122_v40 }
  0x99   :  { %v175_v45 = vadd.f32 %v174_v43, %v123_v41 }
  0x9a   :  { %v177_v46 = vmax.f32 %v155_v44, 0.0 }
  0x9b   :  { %v178_v47 = vmax.f32 %v175_v45, 0.0 }
  0x9c   :  { %198 = vmatmul.f32.vlgmr.msra.gmra.mxu2 %v177_v46 }
  0x9d   :  { %218 = vmatmul.f32.vlgmr.msra.gmra.mxu3 %v178_v47 }
 0x11f   :  { %v199_v49 = vpop.f32.mrf.mxu2 }
 0x120   :  { %v219_v50 = vpop.f32.mrf.mxu3  ;;  %v200_v51 = vadd.f32 %v255_v48, %v199_v49 }
 0x122   :  { %v220_v52 = vadd.f32 %v219_v50, %v200_v51 }
 0x124   :  { %222 = vst [vmem:[#allocation10] sm:$0x3] %v220_v52 }
 0x125   :  { %233 = dma.vmem_to_hbm [thread:$0]  %s229_s16, 32, %s231_s19, [#allocation4]  }
 0x126   :  { %382 = dma.done.wait [#allocation4], 32  }
 0x127   :  { %383 = vsyncadd [#allocation4], 4294967264 }
 0x128   :  { %238 = vsyncpa [#allocation3], 1 }
 0x129   :  { %239 = vsyncpa [#allocation6], 1 }
 0x12a   :  { %240 = vsyncpa [#allocation9], 1 }
 0x12b   :  { %241 = vsyncpa [#allocation4], 1 }

</bundles_post_ra>
